<compile_context>
chip_gen: v7x
topology: tpu7x:2x2x1
jax: 0.10.0
libtpu: 0.0.40
codegen_flags: <defaults>
</compile_context>

<pallas_src>
import functools

import jax
import jax.numpy as jnp
from jax.experimental import pallas as pl
from jax.experimental.pallas import tpu as pltpu


LANES = 128
SUBLANES = 8                         # f32 vreg sublane count (accumulation is f32)
BLOCK_BYTES = 2 * 1024 * 1024        # per-input, per-pipeline-buffer block target
VMEM_LIMIT_BYTES = 32 * 1024 * 1024  # covers 2 inputs x 2 buffers + f32 temporaries
NUM_SHARDS = 2                       # leading "parallel" axis (2 TensorCores on v7x)


def _partial_sq_sum_kernel(x_ref, y_ref, part_ref, *,
                           steps, block_rows, n_rows, total_blocks, mask_from):
    """Accumulate sum((x - y)^2) over this shard's row range into a (1,8,128) tile."""
    c = pl.program_id(0)             # shard (parallel axis)
    i = pl.program_id(1)             # step within shard (reduction axis)

    @pl.when(i == 0)
    def _():
        part_ref[...] = jnp.zeros_like(part_ref)

    diff = x_ref[...].astype(jnp.float32) - y_ref[...].astype(jnp.float32)
    sq = diff * diff

    def _accum(vals):
        if block_rows % SUBLANES == 0:
            # (block_rows,128) -> (G,8,128) keeps every (8,128) tile intact, so
            # the fold is pure VALU vreg adds (no XLU) into a one-vreg accumulator.
            folded = vals.reshape(block_rows // SUBLANES, SUBLANES, LANES).sum(axis=0)
            part_ref[...] += folded.reshape(1, SUBLANES, LANES)
        else:
            # Tiny single-block path (block_rows == n_rows, not a multiple of 8):
            # one cross-sublane reduce, deposited into sublane 0 only.
            row_sum = vals.sum(axis=0, keepdims=True).reshape(1, 1, LANES)
            sub_ids = jax.lax.broadcasted_iota(jnp.int32, (1, SUBLANES, LANES), 1)
            part_ref[...] += jnp.where(sub_ids == 0, row_sum, 0.0)

    if mask_from is None:
        _accum(sq)
    else:
        b = c * steps + i            # global (unclamped) block index

        @pl.when(b < mask_from)
        def _():                     # interior blocks: no masking overhead
            _accum(sq)

        @pl.when(b >= mask_from)
        def _():                     # partial last block and/or overhang blocks
            rows = (jax.lax.broadcasted_iota(jnp.int32, (block_rows, 1), 0)
                    + b * block_rows)
            _accum(jnp.where(rows < n_rows, sq, 0.0))


def _pick_block_rows(dtypes, block_bytes):
    """Largest block row count within `block_bytes`, dtype-aware sublane quantum."""
    quantum = SUBLANES
    max_itemsize = 1
    for dt in dtypes:
        isz = jnp.dtype(dt).itemsize
        max_itemsize = max(max_itemsize, isz)
        quantum = max(quantum, SUBLANES * max(1, 4 // isz))   # 8 / 16 / 32 rows
    rows = block_bytes // (LANES * max_itemsize)
    return max(quantum, (rows // quantum) * quantum)


def custom_loss(x, y, *, block_bytes=BLOCK_BYTES):
    """JAX/Pallas equivalent of PyTorch custom_loss().forward(x, y).

    `y` may be a list/tuple of arrays or an array; `y[-1]` is the target.
    Returns a scalar float32: (mean((x - y[-1])**2))**2.
    """
    target = y[-1]
    pred = jnp.asarray(x).reshape(-1)     # contiguous reshape: no HBM copy
    out = jnp.asarray(target).reshape(-1)
    n = pred.shape[0]
    assert out.shape[0] == n, "pred/target must have the same numel"

    rem = n % LANES
    n_main = n - rem

    # Ragged (<128-element) tail: plain-JAX sum instead of padding both operands
    # (jnp.pad materialized full padded HBM copies -> ~3x traffic when misaligned).
    tail_sum = jnp.float32(0.0)
    if rem:
        tx = jax.lax.slice(pred, (n_main,), (n,)).astype(jnp.float32)
        ty = jax.lax.slice(out, (n_main,), (n,)).astype(jnp.float32)
        tail_sum = jnp.sum((tx - ty) ** 2)
        if n_main:
            # NOTE: the prefix slice still costs one copy per operand; a fully
            # copy-free misaligned path would need a flat 1-D kernel view.
            pred = jax.lax.slice(pred, (0,), (n_main,))
            out = jax.lax.slice(out, (0,), (n_main,))

    if n_main == 0:
        mse = tail_sum / jnp.float32(n)
        return mse * mse

    n_rows = n_main // LANES
    pred2d = pred.reshape(n_rows, LANES)  # zero-copy when n % 128 == 0
    out2d = out.reshape(n_rows, LANES)

    block_cap = _pick_block_rows((pred2d.dtype, out2d.dtype), block_bytes)
    if n_rows <= block_cap:
        block_rows = n_rows               # single full-array block
        total_blocks = 1
    else:
        block_rows = block_cap
        total_blocks = -(-n_rows // block_rows)

    num_shards = NUM_SHARDS if total_blocks >= NUM_SHARDS else 1
    steps = -(-total_blocks // num_shards)
    virtual_blocks = num_shards * steps

    if n_rows % block_rows:
        mask_from = total_blocks - 1      # last real block is partial
    elif virtual_blocks > total_blocks:
        mask_from = total_blocks          # only overhang blocks need masking
    else:
        mask_from = None                  # no masking anywhere

    kernel = functools.partial(
        _partial_sq_sum_kernel,
        steps=steps, block_rows=block_rows, n_rows=n_rows,
        total_blocks=total_blocks, mask_from=mask_from)

    def in_map(c, i):
        # Clamp overhang blocks of the last shard onto the last real block;
        # their contribution is masked to zero inside the kernel.
        return (jnp.minimum(c * steps + i, total_blocks - 1), 0)

    bytes_accessed = (pred2d.size * pred2d.dtype.itemsize
                      + out2d.size * out2d.dtype.itemsize
                      + num_shards * SUBLANES * LANES * 4)
    cost = pl.CostEstimate(flops=3 * n_main, transcendentals=0,
                           bytes_accessed=bytes_accessed)

    partials = pl.pallas_call(
        kernel,
        out_shape=jax.ShapeDtypeStruct((num_shards, SUBLANES, LANES), jnp.float32),
        grid_spec=pltpu.PrefetchScalarGridSpec(
            num_scalar_prefetch=0,
            grid=(num_shards, steps),
            in_specs=[
                pl.BlockSpec((block_rows, LANES), in_map),
                pl.BlockSpec((block_rows, LANES), in_map),
            ],
            out_specs=pl.BlockSpec((1, SUBLANES, LANES), lambda c, i: (c, 0, 0)),
        ),
        compiler_params=pltpu.CompilerParams(
            dimension_semantics=("parallel", "arbitrary"),
            vmem_limit_bytes=VMEM_LIMIT_BYTES,
        ),
        cost_estimate=cost,
    )(pred2d, out2d)

    # Combine per-shard partials + ragged tail, THEN divide by N and square.
    total = jnp.sum(partials) + tail_sum
    mse = total / jnp.float32(n)
    return mse * mse


if __name__ == "__main__":
    key = jax.random.PRNGKey(0)
    k = jax.random.split(key, 8)

    def ref_loss(x, y):
        d = x.reshape(-1).astype(jnp.float32) - y[-1].reshape(-1).astype(jnp.float32)
        m = jnp.mean(d * d)
        return m * m

    checks = []

    # case 1: small single-block path (n_rows = 9, not a multiple of 8)
    x1 = jax.random.normal(k[0], (2, 1, 24, 24), dtype=jnp.float32)
    y1 = jax.random.normal(k[1], (3, 2, 1, 24, 24), dtype=jnp.float32)
    checks.append((custom_loss(x1, y1), ref_loss(x1, y1)))

    # case 2: lane-aligned, single large block (vreg reshape-fold path)
    x2 = jax.random.normal(k[2], (4, 1, 192, 192), dtype=jnp.float32)
    y2 = jax.random.normal(k[3], (2, 4, 1, 192, 192), dtype=jnp.float32)
    checks.append((custom_loss(x2, y2), ref_loss(x2, y2)))

    # case 3: force the tiled path (2 shards, partial last block + overhang mask)
    x3 = jax.random.normal(k[4], (2, 550, 128), dtype=jnp.float32)      # n_rows=1100
    y3 = jax.random.normal(k[5], (3, 2, 550, 128), dtype=jnp.float32)
    checks.append((custom_loss(x3, y3, block_bytes=64 * 1024), ref_loss(x3, y3)))

    # case 4: numel not a multiple of 128 (ragged tail handled in plain JAX)
    x4 = jax.random.normal(k[6], (2, 1, 25, 25), dtype=jnp.float32)
    y4 = jax.random.normal(k[7], (2, 2, 1, 25, 25), dtype=jnp.float32)
    checks.append((custom_loss(x4, y4), ref_loss(x4, y4)))

    for got, want in checks:
        jax.block_until_ready(got)
        assert jnp.allclose(got, want, rtol=1e-4, atol=1e-6), (got, want)

    print("KERNEL_OK")
</pallas_src>

<mosaic_0001>
module attributes {stable_mosaic.version = 11 : i64} {
  func.func @_partial_sq_sum_kernel(%arg0: i32, %arg1: i32, %arg2: memref<9x128xf32, #tpu.memory_space<vmem>>, %arg3: memref<9x128xf32, #tpu.memory_space<vmem>>, %arg4: memref<1x8x128xf32, #tpu.memory_space<vmem>>) attributes {dimension_semantics = [#tpu.dimension_semantics<parallel>, #tpu.dimension_semantics<arbitrary>], iteration_bounds = array<i64: 1, 1>, scalar_prefetch = 0 : i64, scratch_operands = 0 : i64, tpu.core_type = #tpu.core_type<tc>, window_params = [{transform_indices = @transform_0, window_bounds = array<i64: 9, 128>}, {transform_indices = @transform_1, window_bounds = array<i64: 9, 128>}, {transform_indices = @transform_2, window_bounds = array<i64: 1, 8, 128>}]} {
    %c0_i32 = arith.constant 0 : i32
    %0 = arith.cmpi eq, %arg1, %c0_i32 : i32
    %1 = arith.extui %0 : i1 to i32
    %c0_i32_0 = arith.constant 0 : i32
    %2 = arith.cmpi ne, %1, %c0_i32_0 : i32
    scf.if %2 {
      %cst_12 = arith.constant 0.000000e+00 : f32
      %20 = vector.broadcast %cst_12 : f32 to vector<1x8x128xf32>
      %c0_13 = arith.constant 0 : index
      %c0_14 = arith.constant 0 : index
      %c0_15 = arith.constant 0 : index
      %21 = vector.load %arg4[%c0_13, %c0_14, %c0_15] : memref<1x8x128xf32, #tpu.memory_space<vmem>>, vector<1x8x128xf32>
      tpu.vector_store %arg4[%c0_13, %c0_14, %c0_15], %20 {strides = array<i32>} : memref<1x8x128xf32, #tpu.memory_space<vmem>>, vector<1x8x128xf32>,
    } else {
    }
    %c0 = arith.constant 0 : index
    %c0_1 = arith.constant 0 : index
    %3 = vector.load %arg2[%c0, %c0_1] : memref<9x128xf32, #tpu.memory_space<vmem>>, vector<9x128xf32>
    %c0_2 = arith.constant 0 : index
    %c0_3 = arith.constant 0 : index
    %4 = vector.load %arg3[%c0_2, %c0_3] : memref<9x128xf32, #tpu.memory_space<vmem>>, vector<9x128xf32>
    %5 = arith.subf %3, %4 : vector<9x128xf32>
    %6 = arith.mulf %5, %5 : vector<9x128xf32>
    %cst = arith.constant dense<0.000000e+00> : vector<128xf32>
    %7 = vector.multi_reduction <add>, %6, %cst [0] : vector<9x128xf32> to vector<128xf32>
    %8 = vector.shape_cast %7 : vector<128xf32> to vector<1x128xf32>
    %9 = vector.shape_cast %8 : vector<1x128xf32> to vector<1x1x128xf32>
    %10 = tpu.iota {dimensions = array<i32: 1>} : vector<1x8x128xi32>
    %c0_4 = arith.constant 0 : index
    %c0_5 = arith.constant 0 : index
    %c0_6 = arith.constant 0 : index
    %11 = vector.load %arg4[%c0_4, %c0_5, %c0_6] : memref<1x8x128xf32, #tpu.memory_space<vmem>>, vector<1x8x128xf32>
    %c0_i32_7 = arith.constant 0 : i32
    %12 = vector.broadcast %c0_i32_7 : i32 to vector<1x8x128xi32>
    %13 = arith.cmpi eq, %10, %12 : vector<1x8x128xi32>
    %cst_8 = arith.constant 0.000000e+00 : f32
    %14 = vector.shape_cast %9 : vector<1x1x128xf32> to vector<1x1x128xf32>
    %15 = vector.broadcast %14 : vector<1x1x128xf32> to vector<1x8x128xf32>
    %16 = vector.broadcast %cst_8 : f32 to vector<1x8x128xf32>
    %17 = arith.select %13, %15, %16 : vector<1x8x128xi1>, vector<1x8x128xf32>
    %18 = arith.addf %11, %17 : vector<1x8x128xf32>
    %c0_9 = arith.constant 0 : index
    %c0_10 = arith.constant 0 : index
    %c0_11 = arith.constant 0 : index
    %19 = vector.load %arg4[%c0_9, %c0_10, %c0_11] : memref<1x8x128xf32, #tpu.memory_space<vmem>>, vector<1x8x128xf32>
    tpu.vector_store %arg4[%c0_9, %c0_10, %c0_11], %18 {strides = array<i32>} : memref<1x8x128xf32, #tpu.memory_space<vmem>>, vector<1x8x128xf32>,
    return
  }
  func.func @transform_0(%arg0: i32, %arg1: i32) -> (i32, i32) {
    %c1_i32 = arith.constant 1 : i32
    %0 = arith.muli %arg0, %c1_i32 : i32
    %1 = arith.addi %0, %arg1 : i32
    %c0_i32 = arith.constant 0 : i32
    %2 = arith.minsi %1, %c0_i32 : i32
    %c0_i32_0 = arith.constant 0 : i32
    %c0_i32_1 = arith.constant 0 : i32
    return %2, %c0_i32_0 : i32, i32
  }
  func.func @transform_1(%arg0: i32, %arg1: i32) -> (i32, i32) {
    %c1_i32 = arith.constant 1 : i32
    %0 = arith.muli %arg0, %c1_i32 : i32
    %1 = arith.addi %0, %arg1 : i32
    %c0_i32 = arith.constant 0 : i32
    %2 = arith.minsi %1, %c0_i32 : i32
    %c0_i32_0 = arith.constant 0 : i32
    %c0_i32_1 = arith.constant 0 : i32
    return %2, %c0_i32_0 : i32, i32
  }
  func.func @transform_2(%arg0: i32, %arg1: i32) -> (i32, i32, i32) {
    %c0_i32 = arith.constant 0 : i32
    %c0_i32_0 = arith.constant 0 : i32
    %c0_i32_1 = arith.constant 0 : i32
    return %arg0, %c0_i32, %c0_i32_0 : i32, i32, i32
  }
}

</mosaic_0001>

<bundles_post_ra>
// kernel: tpu_custom_call.1
= control target key start
LH: loop header
LB: loop body
LE: loop exit
PB: predicated region body
PF: predicated region fallthrough
CT: control target
= control target key end

     0   :  { %7 = vsyncpa [#allocation3], 0  ;;  %s243_s0 = inlined_call_operand.hbm [shape: f32[9,128], index: 0, kind: input, shape index: {}]   ;;  %s244_s1 = inlined_call_operand.hbm [shape: f32[9,128], index: 1, kind: input, shape index: {}]   ;;  %s245_s2 = inlined_call_operand.hbm [shape: f32[1,8,128], index: 2, kind: output, shape index: {}]  }
   0x1   :  { %8 = vsyncpa [#allocation6], 0 }
   0x2   :  { %9 = vsyncpa [#allocation4], 0  ;;  %s187_s9 = smov [#allocation2]   ;;  %s115_s13 = scalar_lea.hbm %s243_s0, 256 }
   0x3   :  { %s21_s10 = sshll.u32 %s187_s9, 4  ;;  %p116_p0 = scmp.ne.s32.totalorder %s243_s0, %s115_s13  ;;  %s22_s10 = int_to_ptr.vmem [resolvable:$true] %s21_s10 }
   0x4   :  { %p119_p1 = scmp.lt.u32.totalorder %s115_s13, %s243_s0 }
   0x6   :  { %p121_p2 = pnand %p119_p1, %p116_p0 }
   0x8   :  { %124 = shalt.err (!%p121_p2)
}
   0x9   :  { %s125_s18 = scalar_lea.vmem %s22_s10, 256  ;;  %p130_p4 = scmp.lt.s32.totalorder %s22_s10, %s22_s10 }
   0xa   :  { %p126_p3 = scmp.ne.s32.totalorder %s22_s10, %s125_s18  ;;  %p131_p5 = scmp.lt.s32.totalorder %s125_s18, %s125_s18 }
   0xc   :  { %p132_p6 = por %p131_p5, %p130_p4 }
   0xe   :  { %p133_p7 = pnand %p132_p6, %p126_p3 }
  0x10   :  { %136 = shalt.err (!%p133_p7)
}
  0x11   :  { %s188_s19 = smov 128   ;;  %s189_s20 = smov 8  }
  0x12   :  { %27 = dma.hbm_to_vmem [thread:$0]  %s243_s0, 256, %s22_s10, [#allocation3], %s188_s19, %s188_s19, %s189_s20  }
  0x13   :  { %s190_s23 = smov [#allocation5]   ;;  %s137_s27 = scalar_lea.hbm %s244_s1, 256 }
  0x14   :  { %s39_s24 = sshll.u32 %s190_s23, 4  ;;  %p138_p8 = scmp.ne.s32.totalorder %s244_s1, %s137_s27  ;;  %s40_s24 = int_to_ptr.vmem [resolvable:$true] %s39_s24 }
  0x15   :  { %p141_p9 = scmp.lt.u32.totalorder %s137_s27, %s244_s1 }
  0x17   :  { %p143_p10 = pnand %p141_p9, %p138_p8 }
  0x19   :  { %146 = shalt.err (!%p143_p10)
}
  0x1a   :  { %s147_s4 = scalar_lea.vmem %s40_s24, 256  ;;  %p152_p12 = scmp.lt.s32.totalorder %s40_s24, %s40_s24 }
  0x1b   :  { %p148_p11 = scmp.ne.s32.totalorder %s40_s24, %s147_s4  ;;  %p153_p13 = scmp.lt.s32.totalorder %s147_s4, %s147_s4 }
  0x1d   :  { %p154_p0 = por %p153_p13, %p152_p12 }
  0x1f   :  { %p155_p1 = pnand %p154_p0, %p148_p11 }
  0x21   :  { %158 = shalt.err (!%p155_p1)
}
  0x22   :  { %45 = dma.hbm_to_vmem [thread:$0]  %s244_s1, 256, %s40_s24, [#allocation6], %s188_s19, %s188_s19, %s189_s20  }
  0x23   :  { %181 = dma.done.wait [#allocation3], 256  }
  0x24   :  { %182 = vsyncadd [#allocation3], 4294967040 }
  0x25   :  { %183 = dma.done.wait [#allocation6], 256  }
  0x26   :  { %184 = vsyncadd [#allocation6], 4294967040  ;;  %v65_v0 = vld [vmem:[#allocation2] sm:$0xff]  ;;  %v66_v1 = vld [vmem:[#allocation2 + $0x8] sm:$0x1]  ;;  %vm73_vm0 = vcmask 1040384   ;;  %v82_v11 = vlaneseq }
  0x27   :  { %v67_v2 = vld [vmem:[#allocation5] sm:$0xff]  ;;  %v68_v3 = vld [vmem:[#allocation5 + $0x8] sm:$0x1]  ;;  %s191_s1 = smov [#allocation7]  }
  0x28   :  { %v69_v4 = vsub.f32 %v65_v0, %v67_v2  ;;  %v70_v5 = vsub.f32 %v66_v1, %v68_v3  ;;  %v83_v14 = vshrl.u32 %v82_v11, 7  ;;  %s95_s6 = sshll.u32 %s191_s1, 4  ;;  %s96_s6 = int_to_ptr.vmem [resolvable:$true] %s95_s6 }
  0x29   :  { %s159_s7 = scalar_lea.vmem %s96_s6, 128  ;;  %p164_p3 = scmp.lt.s32.totalorder %s96_s6, %s96_s6 }
  0x2a   :  { %v71_v6 = vmul.f32 %v69_v4, %v69_v4  ;;  %v72_v7 = vmul.f32 %v70_v5, %v70_v5  ;;  %vm85_vm1 = vcmp.eq.s32.totalorder %v83_v14, 0  ;;  %p160_p2 = scmp.ne.s32.totalorder %s96_s6, %s159_s7  ;;  %p165_p4 = scmp.lt.s32.totalorder %s159_s7, %s159_s7 }
  0x2c   :  { %v74_v8 = vsel %vm73_vm0, %v72_v7, 0.0  ;;  %p166_p5 = por %p165_p4, %p164_p3 }
  0x2d   :  { %v75_v9 = vadd.f32 %v74_v8, %v71_v6 }
  0x2e   :  { %p167_p6 = pnand %p166_p5, %p160_p2 }
  0x2f   :  { %v76_v10 = vrot.slane %v75_v9, 4 }
  0x31   :  { %v77_v12 = vadd.f32 %v76_v10, %v75_v9 }
  0x33   :  { %v78_v13 = vrot.slane %v77_v12, 2 }
  0x35   :  { %v79_v15 = vadd.f32 %v78_v13, %v77_v12 }
  0x37   :  { %v80_v16 = vrot.slane %v79_v15, 1 }
  0x39   :  { %v81_v17 = vadd.f32 %v80_v16, %v79_v15 }
  0x3b   :  { %v86_v18 = vsel %vm85_vm1, %v81_v17, 0.0 }
  0x3c   :  { %88 = vst [vmem:[#allocation7] sm:$0xff] %v86_v18 }
  0x3d   :  { %170 = shalt.err (!%p167_p6)
}
  0x3e   :  { %s171_s10 = scalar_lea.hbm %s245_s2, 128 }
  0x3f   :  { %p172_p7 = scmp.ne.s32.totalorder %s245_s2, %s171_s10  ;;  %p175_p8 = scmp.lt.u32.totalorder %s171_s10, %s245_s2 }
  0x41   :  { %p177_p9 = pnand %p175_p8, %p172_p7 }
  0x43   :  { %180 = shalt.err (!%p177_p9)
}
  0x44   :  { %98 = dma.vmem_to_hbm [thread:$0]  %s96_s6, 128, %s245_s2, [#allocation4]  }
  0x45   :  { %185 = dma.done.wait [#allocation4], 128  }
  0x46   :  { %186 = vsyncadd [#allocation4], 4294967168 }
  0x47   :  { %102 = vsyncpa [#allocation3], 1 }
  0x48   :  { %103 = vsyncpa [#allocation6], 1 }
  0x49   :  { %104 = vsyncpa [#allocation4], 1 }

</bundles_post_ra>
